<compile_context>
chip_gen: v5e
topology: v5e:2x2
jax: 0.10.0
libtpu: 0.0.40
codegen_flags: <defaults>
</compile_context>

<pallas_src>
import jax
import jax.numpy as jnp
from jax import lax
from jax.experimental import pallas as pl
from jax.experimental.pallas import tpu as pltpu

EMBED_DIM = 4
NUM_HEADS = 1                 # single head: head_dim == EMBED_DIM
FFWD_DIMS = (16, 4)           # last dim == embed_dim so residual + post_ffwd_norm are valid
LN_EPS = 1e-5
NEG_INF = -1e30               # finite "masked" logit (robust vs. -inf -> NaN)

assert NUM_HEADS == 1, "kernel implements the single-head case only"

_E = EMBED_DIM
_H = FFWD_DIMS[0]
PACK_W = max(_E, _H)          # lane width of the packed parameter slab


def _build_param_layout():
    entries = [
        # name, rows, cols   (weights are stored PRE-TRANSPOSED: x @ W^T -> x @ wT)
        ("wqT", _E, _E), ("wkT", _E, _E), ("wvT", _E, _E), ("woT", _E, _E),
        ("w1T", _E, _H), ("w2T", _H, _E),
        ("bq", 1, _E), ("bk", 1, _E), ("bv", 1, _E),
        ("bias_k", 1, _E), ("bias_v", 1, _E), ("bo", 1, _E),
        ("g1", 1, _E), ("be1", 1, _E),
        ("b1", 1, _H), ("gf", 1, _H), ("bef", 1, _H),
        ("b2", 1, _E), ("g3", 1, _E), ("be3", 1, _E),
    ]
    layout, row = {}, 0
    for name, nr, nc in entries:
        layout[name] = (row, nr, nc)
        row += nr
    return layout, row


PARAM_LAYOUT, PARAM_ROWS = _build_param_layout()


def _layernorm(x, g, b):
    mu = jnp.mean(x, axis=-1, keepdims=True)
    var = jnp.mean((x - mu) ** 2, axis=-1, keepdims=True)
    return (x - mu) * lax.rsqrt(var + LN_EPS) * g + b


def attn_block_kernel(q_ref, k_ref, v_ref, mask_ref, p_ref, o_ref):
    Qf = q_ref[...]            # (B*J, E)
    Kf = k_ref[...]            # (B*J, E)
    Vf = v_ref[...]            # (B*J, E) -- also the first residual
    mask = mask_ref[...]       # (B, J, J) finite additive mask (attn_mask + kpm)
    P = p_ref[...]             # (PARAM_ROWS, PACK_W) packed parameter slab

    B, J, _ = mask.shape
    E = Qf.shape[-1]

    def getp(name):
        r, nr, nc = PARAM_LAYOUT[name]
        return P[r:r + nr, 0:nc]

    # ---- in-projections (weights pre-transposed; 1/sqrt(head_dim) folded into q) ----
    q = jnp.dot(Qf, getp("wqT"), preferred_element_type=jnp.float32) + getp("bq")
    k = jnp.dot(Kf, getp("wkT"), preferred_element_type=jnp.float32) + getp("bk")
    v = jnp.dot(Vf, getp("wvT"), preferred_element_type=jnp.float32) + getp("bv")

    bias_k = getp("bias_k")    # (1, E) add_bias_kv extra key (appended AFTER projection)
    bias_v = getp("bias_v")    # (1, E)

    q3 = q.reshape(B, J, E)
    k3 = k.reshape(B, J, E)
    v3 = v.reshape(B, J, E)

    # scores against the J real keys (single additive mask already combined)
    s1 = jnp.einsum("bqd,bkd->bqk", q3, k3,
                    preferred_element_type=jnp.float32) + mask        # (B, J, J)
    # score against the add_bias_kv column (masks are zero-padded there by construction)
    s2 = jnp.sum(q3 * bias_k[None], axis=-1, keepdims=True)           # (B, J, 1)

    # softmax over the J+1 columns without materializing a concat
    m = jnp.maximum(jnp.max(s1, axis=-1, keepdims=True), s2)
    p1 = jnp.exp(s1 - m)
    p2 = jnp.exp(s2 - m)
    denom = jnp.sum(p1, axis=-1, keepdims=True) + p2
    ctx3 = (jnp.einsum("bqk,bkd->bqd", p1, v3, preferred_element_type=jnp.float32)
            + p2 * bias_v[None]) * pl.reciprocal(denom, approx=True)  # (B, J, E)

    ctx = ctx3.reshape(B * J, E)

    attn_out = jnp.dot(ctx, getp("woT"),
                       preferred_element_type=jnp.float32) + getp("bo")

    # residual add (shapes match) + post_attn_norm
    x = attn_out + Vf
    x = _layernorm(x, getp("g1"), getp("be1"))

    # FFWD: Linear(E,H) -> LayerNorm(H) -> ReLU -> Linear(H,E)   (ffwd_dropout=0: no-op)
    resid2 = x
    h = jnp.dot(x, getp("w1T"), preferred_element_type=jnp.float32) + getp("b1")
    h = _layernorm(h, getp("gf"), getp("bef"))
    h = jnp.maximum(h, 0.0)
    h = jnp.dot(h, getp("w2T"), preferred_element_type=jnp.float32) + getp("b2")

    # residual add + post_ffwd_norm
    x = h + resid2
    x = _layernorm(x, getp("g3"), getp("be3"))

    o_ref[...] = x.astype(o_ref.dtype)   # single (B*J, E) store


def init_params(key, embed_dim=EMBED_DIM, ffwd_dims=FFWD_DIMS):
    """Parameters in the same orientation the PyTorch module stores them."""
    E, H = embed_dim, ffwd_dims[0]
    ks = jax.random.split(key, 12)
    s = 0.2
    f32 = jnp.float32
    return {
        # MultiheadAttention packed in_proj (split) + bias_k/bias_v + out_proj
        "wq": s * jax.random.normal(ks[0], (E, E), f32),
        "bq": s * jax.random.normal(ks[1], (1, E), f32),
        "wk": s * jax.random.normal(ks[2], (E, E), f32),
        "bk": s * jax.random.normal(ks[3], (1, E), f32),
        "wv": s * jax.random.normal(ks[4], (E, E), f32),
        "bv": s * jax.random.normal(ks[5], (1, E), f32),
        "bias_k": s * jax.random.normal(ks[6], (1, E), f32),
        "bias_v": s * jax.random.normal(ks[7], (1, E), f32),
        "wo": s * jax.random.normal(ks[8], (E, E), f32),
        "bo": s * jax.random.normal(ks[9], (1, E), f32),
        # post_attn_norm (torch default init: weight=1, bias=0)
        "g1": jnp.ones((1, E), f32),
        "be1": jnp.zeros((1, E), f32),
        # ffwd: Linear(E,H), LayerNorm(H), ReLU, Linear(H,E)
        "w1": s * jax.random.normal(ks[10], (H, E), f32),
        "b1": jnp.zeros((1, H), f32),
        "gf": jnp.ones((1, H), f32),
        "bef": jnp.zeros((1, H), f32),
        "w2": s * jax.random.normal(ks[11], (E, H), f32),
        "b2": jnp.zeros((1, E), f32),
        # post_ffwd_norm
        "g3": jnp.ones((1, E), f32),
        "be3": jnp.zeros((1, E), f32),
    }


def prepare_params(params):
    """ONE-TIME parameter transform + packing (done outside the hot path):
    pre-transpose all weights, fold the 1/sqrt(head_dim) attention scale into the
    q projection, and pack everything into a single (PARAM_ROWS, PACK_W) f32 slab."""
    scale = 1.0 / float(EMBED_DIM) ** 0.5        # head_dim == EMBED_DIM (single head)
    vals = {
        "wqT": params["wq"].T * scale,
        "wkT": params["wk"].T,
        "wvT": params["wv"].T,
        "woT": params["wo"].T,
        "w1T": params["w1"].T,
        "w2T": params["w2"].T,
        "bq": params["bq"] * scale,
        "bk": params["bk"],
        "bv": params["bv"],
        "bias_k": params["bias_k"],
        "bias_v": params["bias_v"],
        "bo": params["bo"],
        "g1": params["g1"], "be1": params["be1"],
        "b1": params["b1"], "gf": params["gf"], "bef": params["bef"],
        "b2": params["b2"], "g3": params["g3"], "be3": params["be3"],
    }
    slab = jnp.zeros((PARAM_ROWS, PACK_W), jnp.float32)
    for name, (r, nr, nc) in PARAM_LAYOUT.items():
        v = jnp.asarray(vals[name], jnp.float32).reshape(nr, nc)
        slab = slab.at[r:r + nr, 0:nc].set(v)
    return slab


def attn_block_forward(packed_params, Q, K, V, key_padding_mask, attn_mask):
    """key_padding_mask: bool (B, J), True = ignore.  attn_mask: float (J, J), additive."""
    B, J, E = Q.shape

    # Combine attn_mask + key_padding_mask into ONE finite additive (B, J, J) mask.
    kpm_add = jnp.where(key_padding_mask, NEG_INF, 0.0).astype(jnp.float32)      # (B, J)
    mask = attn_mask.astype(jnp.float32)[None, :, :] + kpm_add[:, None, :]
    mask = jnp.maximum(mask, NEG_INF)    # clamp any -inf to a finite value (NaN-robust)

    # Flatten batch*seq so the projection / FFWD matmuls see M = B*J rows.
    Qf = Q.reshape(B * J, E).astype(jnp.float32)
    Kf = K.reshape(B * J, E).astype(jnp.float32)
    Vf = V.reshape(B * J, E).astype(jnp.float32)

    def full_spec(shape):
        n = len(shape)
        return pl.BlockSpec(tuple(shape), lambda i, _n=n: (0,) * _n)

    # TODO(synk): if J grows large (v7x has only 64 MiB VMEM), tile the KV axis with an
    # "arbitrary" grid dim + online softmax instead of materializing the (B, J, J) scores;
    # at that size a 2-wide "parallel" row split would also feed v7x's second TensorCore.
    out = pl.pallas_call(
        attn_block_kernel,
        out_shape=jax.ShapeDtypeStruct((B * J, E), jnp.float32),
        grid=(1,),
        in_specs=[full_spec(Qf.shape), full_spec(Kf.shape), full_spec(Vf.shape),
                  full_spec(mask.shape), full_spec(packed_params.shape)],
        out_specs=full_spec((B * J, E)),
        compiler_params=pltpu.CompilerParams(dimension_semantics=("arbitrary",)),
    )(Qf, Kf, Vf, mask, packed_params)
    return out.reshape(B, J, E)


if __name__ == "__main__":
    B, J, E = 2, 8, EMBED_DIM
    key = jax.random.PRNGKey(0)
    kq, kk, kv = jax.random.split(key, 3)
    Q = jax.random.normal(kq, (B, J, E), jnp.float32)
    K = jax.random.normal(kk, (B, J, E), jnp.float32)
    V = jax.random.normal(kv, (B, J, E), jnp.float32)

    # key_padding_mask: True = ignore that key position (last 2 keys of batch 0)
    key_padding_mask = jnp.zeros((B, J), dtype=bool).at[0, J - 2:].set(True)
    # additive float attn_mask (causal) -- large negative above the diagonal
    attn_mask = jnp.triu(jnp.full((J, J), NEG_INF, jnp.float32), k=1)

    params = init_params(jax.random.PRNGKey(42))
    packed = prepare_params(params)   # one-time transform, not per-call
    # NOTE: attn_dropout=0 / ffwd_dropout=0 in the module, so dropout is a no-op.

    out = attn_block_forward(packed, Q, K, V, key_padding_mask, attn_mask)
    jax.block_until_ready(out)

    assert out.shape == (B, J, E), out.shape
    assert bool(jnp.all(jnp.isfinite(out)))
    print("KERNEL_OK")
</pallas_src>

<mosaic_0001>
module attributes {stable_mosaic.version = 11 : i64} {
  func.func @attn_block_kernel(%arg0: i32, %arg1: memref<16x4xf32, #tpu.memory_space<vmem>>, %arg2: memref<16x4xf32, #tpu.memory_space<vmem>>, %arg3: memref<16x4xf32, #tpu.memory_space<vmem>>, %arg4: memref<2x8x8xf32, #tpu.memory_space<vmem>>, %arg5: memref<50x16xf32, #tpu.memory_space<vmem>>, %arg6: memref<16x4xf32, #tpu.memory_space<vmem>>) attributes {dimension_semantics = [#tpu.dimension_semantics<arbitrary>], iteration_bounds = array<i64: 1>, scalar_prefetch = 0 : i64, scratch_operands = 0 : i64, tpu.core_type = #tpu.core_type<tc>, window_params = [{pipeline_mode = #tpu.pipeline_mode<synchronous>, transform_indices = @transform_0, window_bounds = array<i64: 16, 4>}, {pipeline_mode = #tpu.pipeline_mode<synchronous>, transform_indices = @transform_1, window_bounds = array<i64: 16, 4>}, {pipeline_mode = #tpu.pipeline_mode<synchronous>, transform_indices = @transform_2, window_bounds = array<i64: 16, 4>}, {pipeline_mode = #tpu.pipeline_mode<synchronous>, transform_indices = @transform_3, window_bounds = array<i64: 2, 8, 8>}, {pipeline_mode = #tpu.pipeline_mode<synchronous>, transform_indices = @transform_4, window_bounds = array<i64: 50, 16>}, {pipeline_mode = #tpu.pipeline_mode<synchronous>, transform_indices = @transform_5, window_bounds = array<i64: 16, 4>}]} {
    %c0 = arith.constant 0 : index
    %c0_0 = arith.constant 0 : index
    %0 = vector.load %arg1[%c0, %c0_0] : memref<16x4xf32, #tpu.memory_space<vmem>>, vector<16x4xf32>
    %c0_1 = arith.constant 0 : index
    %c0_2 = arith.constant 0 : index
    %1 = vector.load %arg2[%c0_1, %c0_2] : memref<16x4xf32, #tpu.memory_space<vmem>>, vector<16x4xf32>
    %c0_3 = arith.constant 0 : index
    %c0_4 = arith.constant 0 : index
    %2 = vector.load %arg3[%c0_3, %c0_4] : memref<16x4xf32, #tpu.memory_space<vmem>>, vector<16x4xf32>
    %c0_5 = arith.constant 0 : index
    %c0_6 = arith.constant 0 : index
    %c0_7 = arith.constant 0 : index
    %3 = vector.load %arg4[%c0_5, %c0_6, %c0_7] : memref<2x8x8xf32, #tpu.memory_space<vmem>>, vector<2x8x8xf32>
    %c0_8 = arith.constant 0 : index
    %c0_9 = arith.constant 0 : index
    %4 = vector.load %arg5[%c0_8, %c0_9] : memref<50x16xf32, #tpu.memory_space<vmem>>, vector<50x16xf32>
    %5 = vector.extract_strided_slice %4 {offsets = [0, 0], sizes = [4, 4], strides = [1, 1]} : vector<50x16xf32> to vector<4x4xf32>
    %cst = arith.constant dense<0.000000e+00> : vector<16x4xf32>
    %6 = tpu.matmul %0, %5, %cst {dimension_numbers = #tpu.dot_dimension_numbers<[1], [0], [0], [1], [0, 0, 1, 1], [], []>} : vector<16x4xf32>, vector<4x4xf32>, vector<16x4xf32> -> vector<16x4xf32>
    %7 = vector.extract_strided_slice %4 {offsets = [36, 0], sizes = [1, 4], strides = [1, 1]} : vector<50x16xf32> to vector<1x4xf32>
    %8 = vector.broadcast %7 : vector<1x4xf32> to vector<16x4xf32>
    %9 = arith.addf %6, %8 : vector<16x4xf32>
    %10 = vector.extract_strided_slice %4 {offsets = [4, 0], sizes = [4, 4], strides = [1, 1]} : vector<50x16xf32> to vector<4x4xf32>
    %cst_10 = arith.constant dense<0.000000e+00> : vector<16x4xf32>
    %11 = tpu.matmul %1, %10, %cst_10 {dimension_numbers = #tpu.dot_dimension_numbers<[1], [0], [0], [1], [0, 0, 1, 1], [], []>} : vector<16x4xf32>, vector<4x4xf32>, vector<16x4xf32> -> vector<16x4xf32>
    %12 = vector.extract_strided_slice %4 {offsets = [37, 0], sizes = [1, 4], strides = [1, 1]} : vector<50x16xf32> to vector<1x4xf32>
    %13 = vector.broadcast %12 : vector<1x4xf32> to vector<16x4xf32>
    %14 = arith.addf %11, %13 : vector<16x4xf32>
    %15 = vector.extract_strided_slice %4 {offsets = [8, 0], sizes = [4, 4], strides = [1, 1]} : vector<50x16xf32> to vector<4x4xf32>
    %cst_11 = arith.constant dense<0.000000e+00> : vector<16x4xf32>
    %16 = tpu.matmul %2, %15, %cst_11 {dimension_numbers = #tpu.dot_dimension_numbers<[1], [0], [0], [1], [0, 0, 1, 1], [], []>} : vector<16x4xf32>, vector<4x4xf32>, vector<16x4xf32> -> vector<16x4xf32>
    %17 = vector.extract_strided_slice %4 {offsets = [38, 0], sizes = [1, 4], strides = [1, 1]} : vector<50x16xf32> to vector<1x4xf32>
    %18 = vector.broadcast %17 : vector<1x4xf32> to vector<16x4xf32>
    %19 = arith.addf %16, %18 : vector<16x4xf32>
    %20 = vector.extract_strided_slice %4 {offsets = [39, 0], sizes = [1, 4], strides = [1, 1]} : vector<50x16xf32> to vector<1x4xf32>
    %21 = vector.extract_strided_slice %4 {offsets = [40, 0], sizes = [1, 4], strides = [1, 1]} : vector<50x16xf32> to vector<1x4xf32>
    %22 = vector.shape_cast %9 : vector<16x4xf32> to vector<2x8x4xf32>
    %23 = vector.shape_cast %14 : vector<16x4xf32> to vector<2x8x4xf32>
    %24 = vector.shape_cast %19 : vector<16x4xf32> to vector<2x8x4xf32>
    "tpu.trace_start"() <{level = 10 : i32, message = "bqd,bkd->bqk"}> : () -> ()
    %cst_12 = arith.constant dense<0.000000e+00> : vector<2x8x8xf32>
    %25 = tpu.matmul %22, %23, %cst_12 {dimension_numbers = #tpu.dot_dimension_numbers<[2], [2], [1], [1], [0, 0, 0, 1, 1, 1], [0], [0]>} : vector<2x8x4xf32>, vector<2x8x4xf32>, vector<2x8x8xf32> -> vector<2x8x8xf32>
    "tpu.trace_stop"() : () -> ()
    %26 = arith.addf %25, %3 : vector<2x8x8xf32>
    %27 = vector.shape_cast %20 : vector<1x4xf32> to vector<1x1x4xf32>
    %28 = vector.broadcast %27 : vector<1x1x4xf32> to vector<2x8x4xf32>
    %29 = arith.mulf %22, %28 : vector<2x8x4xf32>
    %cst_13 = arith.constant dense<0.000000e+00> : vector<2x8xf32>
    %30 = vector.multi_reduction <add>, %29, %cst_13 [2] : vector<2x8x4xf32> to vector<2x8xf32>
    %31 = vector.shape_cast %30 : vector<2x8xf32> to vector<2x8x1xf32>
    %cst_14 = arith.constant dense<0xFF800000> : vector<2x8xf32>
    %32 = vector.multi_reduction <maximumf>, %26, %cst_14 [2] : vector<2x8x8xf32> to vector<2x8xf32>
    %33 = vector.shape_cast %32 : vector<2x8xf32> to vector<2x8x1xf32>
    %34 = arith.maximumf %33, %31 : vector<2x8x1xf32>
    %35 = vector.broadcast %34 : vector<2x8x1xf32> to vector<2x8x8xf32>
    %36 = arith.subf %26, %35 : vector<2x8x8xf32>
    %37 = math.exp %36 : vector<2x8x8xf32>
    %38 = arith.subf %31, %34 : vector<2x8x1xf32>
    %39 = math.exp %38 : vector<2x8x1xf32>
    %cst_15 = arith.constant dense<0.000000e+00> : vector<2x8xf32>
    %40 = vector.multi_reduction <add>, %37, %cst_15 [2] : vector<2x8x8xf32> to vector<2x8xf32>
    %41 = vector.shape_cast %40 : vector<2x8xf32> to vector<2x8x1xf32>
    %42 = arith.addf %41, %39 : vector<2x8x1xf32>
    "tpu.trace_start"() <{level = 10 : i32, message = "bqk,bkd->bqd"}> : () -> ()
    %cst_16 = arith.constant dense<0.000000e+00> : vector<2x8x4xf32>
    %43 = tpu.matmul %37, %24, %cst_16 {dimension_numbers = #tpu.dot_dimension_numbers<[2], [1], [1], [2], [0, 0, 0, 1, 1, 2], [0], [0]>} : vector<2x8x8xf32>, vector<2x8x4xf32>, vector<2x8x4xf32> -> vector<2x8x4xf32>
    "tpu.trace_stop"() : () -> ()
    %44 = vector.shape_cast %21 : vector<1x4xf32> to vector<1x1x4xf32>
    %45 = vector.broadcast %39 : vector<2x8x1xf32> to vector<2x8x4xf32>
    %46 = vector.broadcast %44 : vector<1x1x4xf32> to vector<2x8x4xf32>
    %47 = arith.mulf %45, %46 : vector<2x8x4xf32>
    %48 = arith.addf %43, %47 : vector<2x8x4xf32>
    %49 = tpu.reciprocal %42 {approx = true} : vector<2x8x1xf32> -> vector<2x8x1xf32>
    %50 = vector.broadcast %49 : vector<2x8x1xf32> to vector<2x8x4xf32>
    %51 = arith.mulf %48, %50 : vector<2x8x4xf32>
    %52 = vector.shape_cast %51 : vector<2x8x4xf32> to vector<16x4xf32>
    %53 = vector.extract_strided_slice %4 {offsets = [12, 0], sizes = [4, 4], strides = [1, 1]} : vector<50x16xf32> to vector<4x4xf32>
    %cst_17 = arith.constant dense<0.000000e+00> : vector<16x4xf32>
    %54 = tpu.matmul %52, %53, %cst_17 {dimension_numbers = #tpu.dot_dimension_numbers<[1], [0], [0], [1], [0, 0, 1, 1], [], []>} : vector<16x4xf32>, vector<4x4xf32>, vector<16x4xf32> -> vector<16x4xf32>
    %55 = vector.extract_strided_slice %4 {offsets = [41, 0], sizes = [1, 4], strides = [1, 1]} : vector<50x16xf32> to vector<1x4xf32>
    %56 = vector.broadcast %55 : vector<1x4xf32> to vector<16x4xf32>
    %57 = arith.addf %54, %56 : vector<16x4xf32>
    %58 = arith.addf %57, %2 : vector<16x4xf32>
    %59 = vector.extract_strided_slice %4 {offsets = [42, 0], sizes = [1, 4], strides = [1, 1]} : vector<50x16xf32> to vector<1x4xf32>
    %60 = vector.extract_strided_slice %4 {offsets = [43, 0], sizes = [1, 4], strides = [1, 1]} : vector<50x16xf32> to vector<1x4xf32>
    %cst_18 = arith.constant dense<0.000000e+00> : vector<16xf32>
    %61 = vector.multi_reduction <add>, %58, %cst_18 [1] : vector<16x4xf32> to vector<16xf32>
    %62 = vector.shape_cast %61 : vector<16xf32> to vector<16x1xf32>
    %cst_19 = arith.constant 4.000000e+00 : f32
    %63 = vector.broadcast %cst_19 : f32 to vector<16x1xf32>
    %64 = arith.divf %62, %63 : vector<16x1xf32>
    %65 = vector.broadcast %64 : vector<16x1xf32> to vector<16x4xf32>
    %66 = arith.subf %58, %65 : vector<16x4xf32>
    %67 = arith.mulf %66, %66 : vector<16x4xf32>
    %cst_20 = arith.constant dense<0.000000e+00> : vector<16xf32>
    %68 = vector.multi_reduction <add>, %67, %cst_20 [1] : vector<16x4xf32> to vector<16xf32>
    %69 = vector.shape_cast %68 : vector<16xf32> to vector<16x1xf32>
    %cst_21 = arith.constant 4.000000e+00 : f32
    %70 = vector.broadcast %cst_21 : f32 to vector<16x1xf32>
    %71 = arith.divf %69, %70 : vector<16x1xf32>
    %72 = vector.broadcast %64 : vector<16x1xf32> to vector<16x4xf32>
    %73 = arith.subf %58, %72 : vector<16x4xf32>
    %cst_22 = arith.constant 9.99999974E-6 : f32
    %74 = vector.broadcast %cst_22 : f32 to vector<16x1xf32>
    %75 = arith.addf %71, %74 : vector<16x1xf32>
    %76 = math.rsqrt %75 : vector<16x1xf32>
    %77 = vector.broadcast %76 : vector<16x1xf32> to vector<16x4xf32>
    %78 = arith.mulf %73, %77 : vector<16x4xf32>
    %79 = vector.broadcast %59 : vector<1x4xf32> to vector<16x4xf32>
    %80 = arith.mulf %78, %79 : vector<16x4xf32>
    %81 = vector.broadcast %60 : vector<1x4xf32> to vector<16x4xf32>
    %82 = arith.addf %80, %81 : vector<16x4xf32>
    %83 = vector.extract_strided_slice %4 {offsets = [16, 0], sizes = [4, 16], strides = [1, 1]} : vector<50x16xf32> to vector<4x16xf32>
    %cst_23 = arith.constant dense<0.000000e+00> : vector<16x16xf32>
    %84 = tpu.matmul %82, %83, %cst_23 {dimension_numbers = #tpu.dot_dimension_numbers<[1], [0], [0], [1], [0, 0, 1, 1], [], []>} : vector<16x4xf32>, vector<4x16xf32>, vector<16x16xf32> -> vector<16x16xf32>
    %85 = vector.extract_strided_slice %4 {offsets = [44, 0], sizes = [1, 16], strides = [1, 1]} : vector<50x16xf32> to vector<1x16xf32>
    %86 = vector.broadcast %85 : vector<1x16xf32> to vector<16x16xf32>
    %87 = arith.addf %84, %86 : vector<16x16xf32>
    %88 = vector.extract_strided_slice %4 {offsets = [45, 0], sizes = [1, 16], strides = [1, 1]} : vector<50x16xf32> to vector<1x16xf32>
    %89 = vector.extract_strided_slice %4 {offsets = [46, 0], sizes = [1, 16], strides = [1, 1]} : vector<50x16xf32> to vector<1x16xf32>
    %cst_24 = arith.constant dense<0.000000e+00> : vector<16xf32>
    %90 = vector.multi_reduction <add>, %87, %cst_24 [1] : vector<16x16xf32> to vector<16xf32>
    %91 = vector.shape_cast %90 : vector<16xf32> to vector<16x1xf32>
    %cst_25 = arith.constant 1.600000e+01 : f32
    %92 = vector.broadcast %cst_25 : f32 to vector<16x1xf32>
    %93 = arith.divf %91, %92 : vector<16x1xf32>
    %94 = vector.broadcast %93 : vector<16x1xf32> to vector<16x16xf32>
    %95 = arith.subf %87, %94 : vector<16x16xf32>
    %96 = arith.mulf %95, %95 : vector<16x16xf32>
    %cst_26 = arith.constant dense<0.000000e+00> : vector<16xf32>
    %97 = vector.multi_reduction <add>, %96, %cst_26 [1] : vector<16x16xf32> to vector<16xf32>
    %98 = vector.shape_cast %97 : vector<16xf32> to vector<16x1xf32>
    %cst_27 = arith.constant 1.600000e+01 : f32
    %99 = vector.broadcast %cst_27 : f32 to vector<16x1xf32>
    %100 = arith.divf %98, %99 : vector<16x1xf32>
    %101 = vector.broadcast %93 : vector<16x1xf32> to vector<16x16xf32>
    %102 = arith.subf %87, %101 : vector<16x16xf32>
    %cst_28 = arith.constant 9.99999974E-6 : f32
    %103 = vector.broadcast %cst_28 : f32 to vector<16x1xf32>
    %104 = arith.addf %100, %103 : vector<16x1xf32>
    %105 = math.rsqrt %104 : vector<16x1xf32>
    %106 = vector.broadcast %105 : vector<16x1xf32> to vector<16x16xf32>
    %107 = arith.mulf %102, %106 : vector<16x16xf32>
    %108 = vector.broadcast %88 : vector<1x16xf32> to vector<16x16xf32>
    %109 = arith.mulf %107, %108 : vector<16x16xf32>
    %110 = vector.broadcast %89 : vector<1x16xf32> to vector<16x16xf32>
    %111 = arith.addf %109, %110 : vector<16x16xf32>
    %cst_29 = arith.constant 0.000000e+00 : f32
    %112 = vector.broadcast %cst_29 : f32 to vector<16x16xf32>
    %113 = arith.maximumf %111, %112 : vector<16x16xf32>
    %114 = vector.extract_strided_slice %4 {offsets = [20, 0], sizes = [16, 4], strides = [1, 1]} : vector<50x16xf32> to vector<16x4xf32>
    %cst_30 = arith.constant dense<0.000000e+00> : vector<16x4xf32>
    %115 = tpu.matmul %113, %114, %cst_30 {dimension_numbers = #tpu.dot_dimension_numbers<[1], [0], [0], [1], [0, 0, 1, 1], [], []>} : vector<16x16xf32>, vector<16x4xf32>, vector<16x4xf32> -> vector<16x4xf32>
    %116 = vector.extract_strided_slice %4 {offsets = [47, 0], sizes = [1, 4], strides = [1, 1]} : vector<50x16xf32> to vector<1x4xf32>
    %117 = vector.broadcast %116 : vector<1x4xf32> to vector<16x4xf32>
    %118 = arith.addf %115, %117 : vector<16x4xf32>
    %119 = arith.addf %118, %82 : vector<16x4xf32>
    %120 = vector.extract_strided_slice %4 {offsets = [48, 0], sizes = [1, 4], strides = [1, 1]} : vector<50x16xf32> to vector<1x4xf32>
    %121 = vector.extract_strided_slice %4 {offsets = [49, 0], sizes = [1, 4], strides = [1, 1]} : vector<50x16xf32> to vector<1x4xf32>
    %cst_31 = arith.constant dense<0.000000e+00> : vector<16xf32>
    %122 = vector.multi_reduction <add>, %119, %cst_31 [1] : vector<16x4xf32> to vector<16xf32>
    %123 = vector.shape_cast %122 : vector<16xf32> to vector<16x1xf32>
    %cst_32 = arith.constant 4.000000e+00 : f32
    %124 = vector.broadcast %cst_32 : f32 to vector<16x1xf32>
    %125 = arith.divf %123, %124 : vector<16x1xf32>
    %126 = vector.broadcast %125 : vector<16x1xf32> to vector<16x4xf32>
    %127 = arith.subf %119, %126 : vector<16x4xf32>
    %128 = arith.mulf %127, %127 : vector<16x4xf32>
    %cst_33 = arith.constant dense<0.000000e+00> : vector<16xf32>
    %129 = vector.multi_reduction <add>, %128, %cst_33 [1] : vector<16x4xf32> to vector<16xf32>
    %130 = vector.shape_cast %129 : vector<16xf32> to vector<16x1xf32>
    %cst_34 = arith.constant 4.000000e+00 : f32
    %131 = vector.broadcast %cst_34 : f32 to vector<16x1xf32>
    %132 = arith.divf %130, %131 : vector<16x1xf32>
    %133 = vector.broadcast %125 : vector<16x1xf32> to vector<16x4xf32>
    %134 = arith.subf %119, %133 : vector<16x4xf32>
    %cst_35 = arith.constant 9.99999974E-6 : f32
    %135 = vector.broadcast %cst_35 : f32 to vector<16x1xf32>
    %136 = arith.addf %132, %135 : vector<16x1xf32>
    %137 = math.rsqrt %136 : vector<16x1xf32>
    %138 = vector.broadcast %137 : vector<16x1xf32> to vector<16x4xf32>
    %139 = arith.mulf %134, %138 : vector<16x4xf32>
    %140 = vector.broadcast %120 : vector<1x4xf32> to vector<16x4xf32>
    %141 = arith.mulf %139, %140 : vector<16x4xf32>
    %142 = vector.broadcast %121 : vector<1x4xf32> to vector<16x4xf32>
    %143 = arith.addf %141, %142 : vector<16x4xf32>
    %c0_36 = arith.constant 0 : index
    %c0_37 = arith.constant 0 : index
    %144 = vector.load %arg6[%c0_36, %c0_37] : memref<16x4xf32, #tpu.memory_space<vmem>>, vector<16x4xf32>
    tpu.vector_store %arg6[%c0_36, %c0_37], %143 {strides = array<i32>} : memref<16x4xf32, #tpu.memory_space<vmem>>, vector<16x4xf32>,
    return
  }
  func.func @transform_0(%arg0: i32) -> (i32, i32) {
    %c0_i32 = arith.constant 0 : i32
    %c0_i32_0 = arith.constant 0 : i32
    %c0_i32_1 = arith.constant 0 : i32
    return %c0_i32, %c0_i32_0 : i32, i32
  }
  func.func @transform_1(%arg0: i32) -> (i32, i32) {
    %c0_i32 = arith.constant 0 : i32
    %c0_i32_0 = arith.constant 0 : i32
    %c0_i32_1 = arith.constant 0 : i32
    return %c0_i32, %c0_i32_0 : i32, i32
  }
  func.func @transform_2(%arg0: i32) -> (i32, i32) {
    %c0_i32 = arith.constant 0 : i32
    %c0_i32_0 = arith.constant 0 : i32
    %c0_i32_1 = arith.constant 0 : i32
    return %c0_i32, %c0_i32_0 : i32, i32
  }
  func.func @transform_3(%arg0: i32) -> (i32, i32, i32) {
    %c0_i32 = arith.constant 0 : i32
    %c0_i32_0 = arith.constant 0 : i32
    %c0_i32_1 = arith.constant 0 : i32
    %c0_i32_2 = arith.constant 0 : i32
    return %c0_i32, %c0_i32_0, %c0_i32_1 : i32, i32, i32
  }
  func.func @transform_4(%arg0: i32) -> (i32, i32) {
    %c0_i32 = arith.constant 0 : i32
    %c0_i32_0 = arith.constant 0 : i32
    %c0_i32_1 = arith.constant 0 : i32
    return %c0_i32, %c0_i32_0 : i32, i32
  }
  func.func @transform_5(%arg0: i32) -> (i32, i32) {
    %c0_i32 = arith.constant 0 : i32
    %c0_i32_0 = arith.constant 0 : i32
    %c0_i32_1 = arith.constant 0 : i32
    return %c0_i32, %c0_i32_0 : i32, i32
  }
}

</mosaic_0001>

<bundles_post_ra>
// kernel: tpu_custom_call.1
= control target key start
LH: loop header
LB: loop body
LE: loop exit
PB: predicated region body
PF: predicated region fallthrough
CT: control target
= control target key end

     0   :  { %vm43_vm0 = vcmask 1043456   ;;  %vm36_vm1 = vcmask 31744   ;;  %vm197_vm2 = vcmask 64512   ;;  %vm404_vm10 = vcmask 130048   ;;  %s791_s4 = inlined_call_operand.vmem [shape: f32[50,16], index: 4, kind: input, shape index: {}]   ;;  %s792_s0 = inlined_call_operand.vmem [shape: f32[16,4], index: 0, kind: input, shape index: {}]   ;;  %s793_s1 = inlined_call_operand.vmem [shape: f32[16,4], index: 1, kind: input, shape index: {}]   ;;  %s794_s2 = inlined_call_operand.vmem [shape: f32[16,4], index: 2, kind: input, shape index: {}]   ;;  %s795_s3 = inlined_call_operand.vmem [shape: f32[2,8,8], index: 3, kind: input, shape index: {}]   ;;  %s796_s5 = inlined_call_operand.vmem [shape: f32[16,4], index: 5, kind: output, shape index: {}]  }
   0x1   :  { %v28_v0 = vld [vmem:[%s791_s4] sm:$0xff]  ;;  %v21_v1 = vld [vmem:[%s792_s0 + $0x8] sm:$0xff] }
   0x2   :  { %584 = vmatpush.msk.msra.mxu1 %vm43_vm0, %v28_v0  ;;  %v71_v2 = vrot.slane %v28_v0, 4  ;;  %561 = vmatpush.msk.msra.mxu0 %vm43_vm0, %v28_v0  ;;  %v20_v3 = vld [vmem:[%s792_s0] sm:$0xff]  ;;  %v23_v5 = vld [vmem:[%s793_s1 + $0x8] sm:$0xff] }
   0x3   :  { %563 = vmatmul.msk.f32.vlgmr.msra.gmra.mxu1 %vm36_vm1, %v21_v1  ;;  %562 = vmatmul.msk.f32.vlgmr.msra.gmra.mxu0 %vm36_vm1, %v20_v3  ;;  %v22_v4 = vld [vmem:[%s793_s1] sm:$0xff]  ;;  %v29_v22 = vld [vmem:[%s791_s4 + $0x8] sm:$0xff] }
   0x4   :  { %564 = vmatpush.msk.msrb.mxu1 %vm43_vm0, %v71_v2  ;;  %v672_v6 = vld [vmem:[%s791_s4 + $0x20] sm:$0xff]  ;;  %567 = vmatpush.msk.msra.mxu2 %vm43_vm0, %v29_v22  ;;  %v280_v24 = vrot.slane %v29_v22, 4  ;;  %v698_v25 = vld [vmem:[%s794_s2 + $0x8] sm:$0xff] }
   0x5   :  { %v35_v7 = vperm.slane %v672_v6, 4  ;;  %v188_v8 = vperm.slane %v672_v6, 7  ;;  %v70_v16 = vperm.slane %v672_v6, 5  ;;  %v689_v23 = vld [vmem:[%s794_s2] sm:$0xff]  ;;  %v27_v30 = vld [vmem:[%s795_s3 + $0x8] sm:$0xff]  ;;  %v103_v34 = vperm.slane %v672_v6, 6 }
   0x6   :  { %568 = vmatmul.msk.f32.vlgmr.msra.gmra.mxu2 %vm36_vm1, %v689_v23  ;;  %v26_v26 = vld [vmem:[%s795_s3] sm:$0xff]  ;;  %v718_v60 = vld [vmem:[%s791_s4 + $0x28] sm:$0xff] }
   0x7   :  { %576 = vmatpush.msk.msrb.mxu2 %vm43_vm0, %v280_v24  ;;  %v226_v61 = vperm.slane %v718_v60, 0 }
   0xb   :  { %565 = vmatmul.msk.f32.vlgmr.msrb.gmra.mxu1 %vm36_vm1, %v22_v4 }
   0xe   :  { %569 = vmatmul.msk.f32.gmra.mxu2 %vm36_vm1, %v698_v25 }
  0x13   :  { %566 = vmatmul.msk.f32.gmra.mxu1 %vm36_vm1, %v23_v5 }
  0x80   :  { %v67_v9 = vpop.f32.mrf.mxu1  ;;  %v64_v10 = vpop.f32.mrf.mxu0 }
  0x81   :  { %v68_v11 = vadd.f32 %v67_v9, %v35_v7  ;;  %v65_v12 = vadd.f32 %v64_v10, %v35_v7 }
  0x83   :  { %v190_v13 = vmul.f32 %v188_v8, %v68_v11  ;;  %v189_v14 = vmul.f32 %v188_v8, %v65_v12 }
  0x85   :  { %v194_v15 = vsel %vm36_vm1, %v190_v13, 0.0  ;;  %v191_v17 = vsel %vm36_vm1, %v189_v14, 0.0 }
  0x86   :  { %195 = vadd.xlane.f32.xlu1 %v194_v15  ;;  %192 = vadd.xlane.f32.xlu0 %v191_v17 }
  0x88   :  { %v97_v18 = vpop.f32.mrf.mxu1 }
  0x89   :  { %v98_v19 = vadd.f32 %v97_v18, %v70_v16  ;;  %v130_v35 = vpop.f32.mrf.mxu2 }
  0x8a   :  { %v131_v36 = vadd.f32 %v130_v35, %v103_v34 }
  0x8b   :  { %570 = vmatpush.xpose.msk.msra.mxu3 %vm36_vm1, %v98_v19 }
  0x8c   :  { %247 = vmatpush.msrb.mxu0 %v131_v36 }
  0x8e   :  { %571 = vmatmul.msk.f32.vlgmr.msra.gmra.mxu3 %vm36_vm1, %v65_v12  ;;  %v279_v12 = vperm.slane %v718_v60, 1 }
  0x90   :  { %v100_v20 = vpop.f32.mrf.mxu1 }
  0x91   :  { %v101_v21 = vadd.f32 %v100_v20, %v70_v16  ;;  %v133_v37 = vpop.f32.mrf.mxu2 }
  0x92   :  { %v134_v38 = vadd.f32 %v133_v37, %v103_v34 }
  0x93   :  { %572 = vmatpush.xpose.msk.msrb.mxu3 %vm36_vm1, %v101_v21  ;;  %v615_v21 = vmov 4.0  }
  0x94   :  { %270 = vmatpush.msra.mxu1 %v134_v38  ;;  %v737_v38 = vld [vmem:[%s791_s4 + $0x10] sm:$0xff] }
  0x96   :  { %573 = vmatmul.msk.f32.vlgmr.msrb.gmra.mxu3 %vm36_vm1, %v68_v11 }
  0x97   :  { %579 = vmatpush.msk.msra.mxu3 %vm43_vm0, %v737_v38 }
  0xf9   :  { %v193_v39 = vpop.xlane.xlu0 %192  ;;  %v196_v40 = vpop.xlane.xlu1 %195 }
 0x111   :  { %v159_v27 = vpop.f32.mrf.mxu3 }
 0x112   :  { %v160_v28 = vadd.f32 %v159_v27, %v26_v26 }
 0x114   :  { %v198_v29 = vsel %vm197_vm2, %v160_v28, -inf }
 0x115   :  { %199 = vmax.xlane.f32.xlu0 %v198_v29 }
 0x119   :  { %v185_v31 = vpop.f32.mrf.mxu3 }
 0x11a   :  { %v186_v32 = vadd.f32 %v185_v31, %v27_v30 }
 0x11c   :  { %v201_v33 = vsel %vm197_vm2, %v186_v32, -inf }
 0x11d   :  { %202 = vmax.xlane.f32.xlu1 %v201_v33 }
 0x188   :  { %v200_v41 = vpop.xlane.xlu0 %199 }
 0x189   :  { %v204_v42 = vmax.f32 %v200_v41, %v193_v39 }
 0x18b   :  { %v206_v43 = vsub.f32 %v160_v28, %v204_v42  ;;  %v212_v44 = vsub.f32 %v193_v39, %v204_v42 }
 0x18d   :  { %v208_v45 = vmul.f32 1.442695, %v206_v43  ;;  %v214_v55 = vmul.f32 1.442695, %v212_v44 }
 0x18f   :  { %587 = vpow2.f32 %v208_v45 }
 0x190   :  { %v203_v46 = vpop.xlane.xlu1 %202 }
 0x191   :  { %v205_v47 = vmax.f32 %v203_v46, %v196_v40 }
 0x193   :  { %v207_v48 = vsub.f32 %v186_v32, %v205_v47  ;;  %v213_v49 = vsub.f32 %v196_v40, %v205_v47 }
 0x195   :  { %v588_v50 = vpop.eup %587  ;;  %v210_v51 = vmul.f32 1.442695, %v207_v48  ;;  %v216_v56 = vmul.f32 1.442695, %v213_v49 }
 0x196   :  { %574 = vmatmul.msk.f32.vlgmr.msrb.gmra.mxu0 %vm197_vm2, %v588_v50  ;;  %v218_v52 = vsel %vm197_vm2, %v588_v50, 0.0 }
 0x197   :  { %589 = vpow2.f32 %v210_v51  ;;  %219 = vadd.xlane.f32.xlu2 %v218_v52 }
 0x198   :  { %591 = vpow2.f32 %v214_v55 }
 0x199   :  { %593 = vpow2.f32 %v216_v56 }
 0x19d   :  { %v590_v53 = vpop.eup %589 }
 0x19e   :  { %575 = vmatmul.msk.f32.vlgmr.msra.gmra.mxu1 %vm197_vm2, %v590_v53  ;;  %v221_v54 = vsel %vm197_vm2, %v590_v53, 0.0  ;;  %v592_v57 = vpop.eup %591  ;;  %v365_v53 = vperm.slane %v718_v60, 2 }
 0x19f   :  { %222 = vadd.xlane.f32.xlu2 %v221_v54  ;;  %v594_v62 = vpop.eup %593  ;;  %v227_v0 = vmul.f32 %v592_v57, %v226_v61 }
 0x1a0   :  { %v228_v7 = vmul.f32 %v594_v62, %v226_v61 }
 0x20a   :  { %v220_v58 = vpop.xlane.xlu2 %219 }
 0x20b   :  { %v224_v59 = vadd.f32 %v592_v57, %v220_v58  ;;  %v368_v57 = vperm.slane %v718_v60, 3 }
 0x20d   :  { %595 = vrcp.f32 %v224_v59 }
 0x212   :  { %v223_v63 = vpop.xlane.xlu2 %222 }
 0x213   :  { %v225_v1 = vadd.f32 %v594_v62, %v223_v63  ;;  %v249_v2 = vpop.f32.mrf.mxu0  ;;  %v596_v4 = vpop.eup %595 }
 0x214   :  { %v250_v3 = vadd.f32 %v249_v2, %v227_v0 }
 0x215   :  { %597 = vrcp.f32 %v225_v1 }
 0x216   :  { %v277_v5 = vmul.f32 %v596_v4, %v250_v3  ;;  %599 = vrcp.f32 %v615_v21  ;;  %v371_v4 = vperm.slane %v718_v60, 4 }
 0x218   :  { %577 = vmatmul.msk.f32.vlgmr.msrb.gmra.mxu2 %vm36_vm1, %v277_v5 }
 0x21b   :  { %v272_v8 = vpop.f32.mrf.mxu1  ;;  %v598_v10 = vpop.eup %597 }
 0x21c   :  { %v273_v9 = vadd.f32 %v272_v8, %v228_v7  ;;  %v600_v22 = vpop.eup %599 }
 0x21d   :  { %v321_v24 = vmul.f32 4.0, %v600_v22  ;;  %vm325_vm3 = vweird.f32 %v600_v22 }
 0x21e   :  { %v278_v11 = vmul.f32 %v598_v10, %v273_v9 }
 0x21f   :  { %v322_v26 = vsub.f32 1.0, %v321_v24 }
 0x220   :  { %578 = vmatmul.msk.f32.gmra.mxu2 %vm36_vm1, %v278_v11 }
 0x221   :  { %v323_v27 = vmul.f32 %v600_v22, %v322_v26 }
 0x223   :  { %v324_v28 = vadd.f32 %v600_v22, %v323_v27 }
 0x225   :  { %v728_v29 = vsel %vm325_vm3, %v600_v22, %v324_v28 }
 0x29b   :  { %v306_v13 = vpop.f32.mrf.mxu2 }
 0x29c   :  { %v307_v14 = vadd.f32 %v306_v13, %v279_v12 }
 0x29e   :  { %v312_v15 = vadd.f32 %v307_v14, %v689_v23 }
 0x2a0   :  { %v314_v16 = vsel %vm36_vm1, %v312_v15, 0.0 }
 0x2a1   :  { %315 = vadd.xlane.f32.xlu0 %v314_v16 }
 0x2a3   :  { %v309_v17 = vpop.f32.mrf.mxu2 }
 0x2a4   :  { %v310_v18 = vadd.f32 %v309_v17, %v279_v12  ;;  %v616_v12 = vmov 16.0  }
 0x2a6   :  { %v313_v19 = vadd.f32 %v310_v18, %v698_v25 }
 0x2a8   :  { %v317_v20 = vsel %vm36_vm1, %v313_v19, 0.0 }
 0x2a9   :  { %318 = vadd.xlane.f32.xlu1 %v317_v20 }
 0x314   :  { %v316_v23 = vpop.xlane.xlu0 %315 }
 0x315   :  { %v327_v30 = vmul.f32 %v728_v29, %v316_v23 }
 0x317   :  { %v329_v31 = vsub.f32 %v312_v15, %v327_v30 }
 0x319   :  { %v331_v32 = vmul.f32 %v329_v31, %v329_v31 }
 0x31b   :  { %v333_v25 = vsel %vm36_vm1, %v331_v32, 0.0 }
 0x31c   :  { %334 = vadd.xlane.f32.xlu2 %v333_v25  ;;  %v319_v33 = vpop.xlane.xlu1 %318  ;;  %v470_v25 = vrot.slane %v672_v6, 4 }
 0x31d   :  { %v328_v34 = vmul.f32 %v728_v29, %v319_v33 }
 0x31f   :  { %v330_v35 = vsub.f32 %v313_v19, %v328_v34  ;;  %v467_v34 = vrot.slane %v737_v38, 4 }
 0x321   :  { %v332_v36 = vmul.f32 %v330_v35, %v330_v35 }
 0x323   :  { %v336_v37 = vsel %vm36_vm1, %v332_v36, 0.0 }
 0x324   :  { %337 = vadd.xlane.f32.xlu0 %v336_v37 }
 0x38f   :  { %v335_v39 = vpop.xlane.xlu2 %334 }
 0x390   :  { %v339_v40 = vmul.f32 %v335_v39, %v728_v29 }
 0x392   :  { %v341_v41 = vadd.f32 1e-05, %v339_v40 }
 0x394   :  { %601 = vrsqrt.f32 %v341_v41  ;;  %vm349_vm5 = vweird.f32 %v341_v41 }
 0x397   :  { %v338_v42 = vpop.xlane.xlu0 %337 }
 0x398   :  { %v340_v43 = vmul.f32 %v338_v42, %v728_v29 }
 0x39a   :  { %v602_v44 = vpop.eup %601  ;;  %v342_v45 = vadd.f32 1e-05, %v340_v43 }
 0x39b   :  { %v344_v46 = vmul.f32 %v602_v44, %v341_v41  ;;  %vm350_vm4 = vweird.f32 %v602_v44 }
 0x39c   :  { %603 = vrsqrt.f32 %v342_v45  ;;  %vm351_vm6 = vmor %vm349_vm5, %vm350_vm4  ;;  %vm359_vm8 = vweird.f32 %v342_v45 }
 0x39d   :  { %v345_v47 = vmul.f32 %v602_v44, %v344_v46  ;;  %605 = vrcp.f32 %v616_v12 }
 0x39f   :  { %v346_v48 = vmul.f32 0.5, %v345_v47 }
 0x3a1   :  { %v347_v49 = vsub.f32 1.5, %v346_v48 }
 0x3a2   :  { %v604_v50 = vpop.eup %603 }
 0x3a3   :  { %v348_v51 = vmul.f32 %v602_v44, %v347_v49  ;;  %v354_v52 = vmul.f32 %v604_v50, %v342_v45  ;;  %vm360_vm7 = vweird.f32 %v604_v50  ;;  %v606_v13 = vpop.eup %605  ;;  %v456_v49 = vperm.slane %v718_v60, 5 }
 0x3a4   :  { %vm361_vm9 = vmor %vm359_vm8, %vm360_vm7  ;;  %v412_v14 = vmul.f32 16.0, %v606_v13  ;;  %vm416_vm11 = vweird.f32 %v606_v13 }
 0x3a5   :  { %v352_v54 = vsel %vm351_vm6, %v602_v44, %v348_v51  ;;  %v355_v55 = vmul.f32 %v604_v50, %v354_v52 }
 0x3a6   :  { %v363_v56 = vmul.f32 %v352_v54, %v329_v31  ;;  %v413_v15 = vsub.f32 1.0, %v412_v14  ;;  %v31_v31 = vld [vmem:[%s791_s4 + $0x18] sm:$0xff] }
 0x3a7   :  { %v356_v58 = vmul.f32 0.5, %v355_v55  ;;  %v468_v32 = vrot.slane %v31_v31, 4 }
 0x3a8   :  { %v366_v59 = vmul.f32 %v365_v53, %v363_v56  ;;  %v414_v16 = vmul.f32 %v606_v13, %v413_v15 }
 0x3a9   :  { %v357_v61 = vsub.f32 1.5, %v356_v58  ;;  %v471_v33 = vsel %vm43_vm0, %v468_v32, %v470_v25  ;;  %v34_v25 = vld [vmem:[%s791_s4 + $0x30] sm:$0x3] }
 0x3aa   :  { %v745_v62 = vadd.f32 %v368_v57, %v366_v59  ;;  %v415_v17 = vadd.f32 %v606_v13, %v414_v16  ;;  %494 = vmatpush.msra.mxu0 %v471_v33 }
 0x3ab   :  { %v358_v63 = vmul.f32 %v604_v50, %v357_v61 }
 0x3ac   :  { %580 = vmatmul.msk.f32.vlgmr.msra.gmra.mxu3 %vm36_vm1, %v745_v62  ;;  %v417_v18 = vsel %vm416_vm11, %v606_v13, %v415_v17 }
 0x3ad   :  { %v362_v0 = vsel %vm361_vm9, %v604_v50, %v358_v63 }
 0x3ae   :  { %v364_v1 = vmul.f32 %v362_v0, %v330_v35  ;;  %v469_v35 = vsel %vm43_vm0, %v467_v34, %v468_v32 }
 0x3af   :  { %495 = vmatpush.msra.mxu0 %v469_v35 }
 0x3b0   :  { %v367_v2 = vmul.f32 %v365_v53, %v364_v1  ;;  %v459_v53 = vperm.slane %v718_v60, 6 }
 0x3b2   :  { %v749_v3 = vadd.f32 %v368_v57, %v367_v2 }
 0x3b4   :  { %581 = vmatmul.msk.f32.gmra.mxu3 %vm36_vm1, %v749_v3 }
 0x42f   :  { %v398_v5 = vpop.f32.mrf.mxu3 }
 0x430   :  { %v399_v7 = vadd.f32 %v398_v5, %v371_v4 }
 0x432   :  { %v405_v8 = vsel %vm404_vm10, %v399_v7, 0.0 }
 0x433   :  { %406 = vadd.xlane.f32.xlu1 %v405_v8 }
 0x437   :  { %v401_v9 = vpop.f32.mrf.mxu3 }
 0x438   :  { %v402_v10 = vadd.f32 %v401_v9, %v371_v4  ;;  %v464_v4 = vperm.slane %v718_v60, 7 }
 0x43a   :  { %v408_v11 = vsel %vm404_vm10, %v402_v10, 0.0 }
 0x43b   :  { %409 = vadd.xlane.f32.xlu2 %v408_v11 }
 0x4a6   :  { %v407_v19 = vpop.xlane.xlu1 %406 }
 0x4a7   :  { %v418_v20 = vmul.f32 %v417_v18, %v407_v19 }
 0x4a9   :  { %v420_v21 = vsub.f32 %v399_v7, %v418_v20 }
 0x4ab   :  { %v422_v22 = vmul.f32 %v420_v21, %v420_v21 }
 0x4ad   :  { %v424_v24 = vsel %vm404_vm10, %v422_v22, 0.0 }
 0x4ae   :  { %v410_v26 = vpop.xlane.xlu2 %409  ;;  %425 = vadd.xlane.f32.xlu0 %v424_v24 }
 0x4af   :  { %v419_v27 = vmul.f32 %v417_v18, %v410_v26 }
 0x4b1   :  { %v421_v28 = vsub.f32 %v402_v10, %v419_v27 }
 0x4b3   :  { %v423_v23 = vmul.f32 %v421_v28, %v421_v28 }
 0x4b5   :  { %v427_v30 = vsel %vm404_vm10, %v423_v23, 0.0 }
 0x4b6   :  { %428 = vadd.xlane.f32.xlu1 %v427_v30 }
 0x521   :  { %v426_v36 = vpop.xlane.xlu0 %425 }
 0x522   :  { %v430_v37 = vmul.f32 %v426_v36, %v417_v18 }
 0x524   :  { %v432_v39 = vadd.f32 1e-05, %v430_v37  ;;  %v549_v37 = vperm.slane %v34_v25, 0 }
 0x526   :  { %607 = vrsqrt.f32 %v432_v39  ;;  %vm440_vm13 = vweird.f32 %v432_v39 }
 0x529   :  { %v429_v40 = vpop.xlane.xlu1 %428 }
 0x52a   :  { %v431_v41 = vmul.f32 %v429_v40, %v417_v18  ;;  %v552_v40 = vperm.slane %v34_v25, 1 }
 0x52c   :  { %v608_v42 = vpop.eup %607  ;;  %v433_v43 = vadd.f32 1e-05, %v431_v41 }
 0x52d   :  { %v435_v44 = vmul.f32 %v608_v42, %v432_v39  ;;  %vm441_vm12 = vweird.f32 %v608_v42 }
 0x52e   :  { %609 = vrsqrt.f32 %v433_v43  ;;  %vm442_vm14 = vmor %vm440_vm13, %vm441_vm12  ;;  %vm450_vm0 = vweird.f32 %v433_v43 }
 0x52f   :  { %v436_v45 = vmul.f32 %v608_v42, %v435_v44 }
 0x531   :  { %v437_v6 = vmul.f32 0.5, %v436_v45 }
 0x533   :  { %v438_v46 = vsub.f32 1.5, %v437_v6 }
 0x534   :  { %v610_v47 = vpop.eup %609 }
 0x535   :  { %v439_v38 = vmul.f32 %v608_v42, %v438_v46  ;;  %v445_v48 = vmul.f32 %v610_v47, %v433_v43  ;;  %vm451_vm15 = vweird.f32 %v610_v47 }
 0x536   :  { %vm452_vm2 = vmor %vm450_vm0, %vm451_vm15 }
 0x537   :  { %v443_v50 = vsel %vm442_vm14, %v608_v42, %v439_v38  ;;  %v446_v51 = vmul.f32 %v610_v47, %v445_v48 }
 0x538   :  { %v454_v52 = vmul.f32 %v443_v50, %v420_v21 }
 0x539   :  { %v447_v54 = vmul.f32 0.5, %v446_v51 }
 0x53a   :  { %v457_v55 = vmul.f32 %v456_v49, %v454_v52 }
 0x53b   :  { %v448_v56 = vsub.f32 1.5, %v447_v54 }
 0x53c   :  { %v460_v57 = vadd.f32 %v459_v53, %v457_v55 }
 0x53d   :  { %v449_v58 = vmul.f32 %v610_v47, %v448_v56 }
 0x53e   :  { %v462_v59 = vmax.f32 %v460_v57, 0.0 }
 0x53f   :  { %v453_v61 = vsel %vm452_vm2, %v610_v47, %v449_v58 }
 0x540   :  { %582 = vmatmul.msk.f32.vlgmr.msra.gmra.mxu0 %vm404_vm10, %v462_v59  ;;  %v455_v63 = vmul.f32 %v453_v61, %v421_v28 }
 0x542   :  { %v458_v0 = vmul.f32 %v456_v49, %v455_v63 }
 0x544   :  { %v461_v1 = vadd.f32 %v459_v53, %v458_v0 }
 0x546   :  { %v463_v2 = vmax.f32 %v461_v1, 0.0 }
 0x548   :  { %583 = vmatmul.msk.f32.gmra.mxu0 %vm404_vm10, %v463_v2 }
 0x5bd   :  { %v497_v5 = vpop.f32.mrf.mxu0 }
 0x5be   :  { %v498_v7 = vadd.f32 %v497_v5, %v464_v4 }
 0x5c0   :  { %v503_v8 = vadd.f32 %v498_v7, %v745_v62 }
 0x5c2   :  { %v505_v9 = vsel %vm36_vm1, %v503_v8, 0.0 }
 0x5c3   :  { %506 = vadd.xlane.f32.xlu2 %v505_v9 }
 0x5c5   :  { %v500_v10 = vpop.f32.mrf.mxu0 }
 0x5c6   :  { %v501_v11 = vadd.f32 %v500_v10, %v464_v4 }
 0x5c8   :  { %v504_v12 = vadd.f32 %v501_v11, %v749_v3 }
 0x5ca   :  { %v508_v13 = vsel %vm36_vm1, %v504_v12, 0.0 }
 0x5cb   :  { %509 = vadd.xlane.f32.xlu0 %v508_v13 }
 0x636   :  { %v507_v14 = vpop.xlane.xlu2 %506 }
 0x637   :  { %v511_v15 = vmul.f32 %v507_v14, %v728_v29 }
 0x639   :  { %v513_v16 = vsub.f32 %v503_v8, %v511_v15 }
 0x63b   :  { %v515_v17 = vmul.f32 %v513_v16, %v513_v16 }
 0x63d   :  { %v517_v60 = vsel %vm36_vm1, %v515_v17, 0.0 }
 0x63e   :  { %518 = vadd.xlane.f32.xlu1 %v517_v60  ;;  %v510_v18 = vpop.xlane.xlu0 %509 }
 0x63f   :  { %v512_v62 = vmul.f32 %v510_v18, %v728_v29 }
 0x641   :  { %v514_v19 = vsub.f32 %v504_v12, %v512_v62 }
 0x643   :  { %v516_v20 = vmul.f32 %v514_v19, %v514_v19 }
 0x645   :  { %v520_v21 = vsel %vm36_vm1, %v516_v20, 0.0 }
 0x646   :  { %521 = vadd.xlane.f32.xlu2 %v520_v21 }
 0x6b1   :  { %v519_v3 = vpop.xlane.xlu1 %518 }
 0x6b2   :  { %v523_v22 = vmul.f32 %v519_v3, %v728_v29 }
 0x6b4   :  { %v525_v24 = vadd.f32 1e-05, %v523_v22 }
 0x6b6   :  { %611 = vrsqrt.f32 %v525_v24  ;;  %vm533_vm4 = vweird.f32 %v525_v24 }
 0x6b9   :  { %v522_v26 = vpop.xlane.xlu2 %521 }
 0x6ba   :  { %v524_v27 = vmul.f32 %v522_v26, %v728_v29 }
 0x6bc   :  { %v612_v28 = vpop.eup %611  ;;  %v526_v23 = vadd.f32 1e-05, %v524_v27 }
 0x6bd   :  { %v528_v30 = vmul.f32 %v612_v28, %v525_v24  ;;  %vm534_vm3 = vweird.f32 %v612_v28 }
 0x6be   :  { %613 = vrsqrt.f32 %v526_v23  ;;  %vm535_vm5 = vmor %vm533_vm4, %vm534_vm3  ;;  %vm543_vm7 = vweird.f32 %v526_v23 }
 0x6bf   :  { %v529_v31 = vmul.f32 %v612_v28, %v528_v30 }
 0x6c1   :  { %v530_v32 = vmul.f32 0.5, %v529_v31 }
 0x6c3   :  { %v531_v33 = vsub.f32 1.5, %v530_v32 }
 0x6c4   :  { %v614_v34 = vpop.eup %613 }
 0x6c5   :  { %v532_v35 = vmul.f32 %v612_v28, %v531_v33  ;;  %v538_v36 = vmul.f32 %v614_v34, %v526_v23  ;;  %vm544_vm6 = vweird.f32 %v614_v34 }
 0x6c6   :  { %vm545_vm8 = vmor %vm543_vm7, %vm544_vm6 }
 0x6c7   :  { %v536_v39 = vsel %vm535_vm5, %v612_v28, %v532_v35  ;;  %v539_v29 = vmul.f32 %v614_v34, %v538_v36 }
 0x6c8   :  { %v547_v41 = vmul.f32 %v536_v39, %v513_v16 }
 0x6c9   :  { %v540_v42 = vmul.f32 0.5, %v539_v29 }
 0x6ca   :  { %v550_v43 = vmul.f32 %v549_v37, %v547_v41 }
 0x6cb   :  { %v541_v44 = vsub.f32 1.5, %v540_v42 }
 0x6cc   :  { %v553_v45 = vadd.f32 %v552_v40, %v550_v43 }
 0x6cd   :  { %v542_v6 = vmul.f32 %v614_v34, %v541_v44 }
 0x6ce   :  { %555 = vst.msk [vmem:[%s796_s5] sm:$0xff] %vm36_vm1, %v553_v45 }
 0x6cf   :  { %v546_v46 = vsel %vm545_vm8, %v614_v34, %v542_v6 }
 0x6d0   :  { %v548_v47 = vmul.f32 %v546_v46, %v514_v19 }
 0x6d2   :  { %v551_v38 = vmul.f32 %v549_v37, %v548_v47 }
 0x6d4   :  { %v554_v48 = vadd.f32 %v552_v40, %v551_v38 }
 0x6d6   :  { %556 = vst.msk [vmem:[%s796_s5 + $0x8] sm:$0xff] %vm36_vm1, %v554_v48 }

</bundles_post_ra>
